<compile_context>
chip_gen: v6e
topology: v6e:2x2x1
jax: 0.10.0
libtpu: 0.0.40
codegen_flags: <defaults>
</compile_context>

<pallas_src>
import jax
import jax.numpy as jnp
from jax.experimental import pallas as pl
from jax.experimental.pallas import tpu as pltpu


# ----------------------------------------------------------------------------
# Resident-W path (small / medium W): one kernel invocation, no grid,
# single-buffered whole-array VMEM operands.
# ----------------------------------------------------------------------------
def _siamese_resident_kernel(x_ref, w_ref, bw_ref, v_ref, bv_ref, o_ref):
    # x_ref : [2, D] f32   (row 0 = cur_audio[0], row 1 = comp_audio[0])
    # w_ref : [D, H] bf16  (persistent bf16 copy, converted once at init)
    # bw_ref: [1, H] f32   v_ref: [1, H] f32 (lane-dense head weights)
    # bv_ref: (1,)  f32 in SMEM      o_ref: [1, 1] f32
    x = x_ref[...].astype(jnp.bfloat16)                         # 2 rows, cheap
    h = jnp.dot(x, w_ref[...], preferred_element_type=jnp.float32)  # [2, H] f32
    h = jnp.maximum(h + bw_ref[...], 0.0)                       # bias + ReLU (f32 VPU)
    d = jnp.abs(h[0:1, :] - h[1:2, :])                          # [1, H] L1 distance
    # Head: VPU multiply + lane (XLU) reduction instead of a 1-column matmul.
    logits = jnp.sum(d * v_ref[...], axis=-1, keepdims=True)    # [1, 1]
    o_ref[...] = jax.nn.sigmoid(logits + bv_ref[0])             # scalar bias from SMEM


def _similarity_resident(x2, params):
    D = x2.shape[1]
    H = params["bw"].shape[1]
    w_bytes = D * H * 2  # bf16
    # Single-buffered resident W + small operands + headroom.
    vmem_limit = min(100 * 1024 * 1024, max(16 * 1024 * 1024, w_bytes + (4 << 20)))
    return pl.pallas_call(
        _siamese_resident_kernel,
        out_shape=jax.ShapeDtypeStruct((1, 1), jnp.float32),
        in_specs=[
            pl.BlockSpec(memory_space=pltpu.MemorySpace.VMEM),   # x  [2, D]
            pl.BlockSpec(memory_space=pltpu.MemorySpace.VMEM),   # W  bf16 (resident)
            pl.BlockSpec(memory_space=pltpu.MemorySpace.VMEM),   # bW [1, H]
            pl.BlockSpec(memory_space=pltpu.MemorySpace.VMEM),   # v  [1, H]
            pl.BlockSpec(memory_space=pltpu.MemorySpace.SMEM),   # bv scalar
        ],
        out_specs=pl.BlockSpec(memory_space=pltpu.MemorySpace.VMEM),
        compiler_params=pltpu.CompilerParams(vmem_limit_bytes=vmem_limit),
    )(x2, params["w_bf16"], params["bw"], params["v_row"], params["bv"])


# ----------------------------------------------------------------------------
# Tiled path (large W): streams W at HBM roofline with BlockSpec pipelining,
# H axis "parallel" (v7x megacore), D reduction last + f32 accumulator.
# ----------------------------------------------------------------------------
def _siamese_tiled_kernel(x_ref, w_ref, bw_ref, v_ref, o_ref, acc_ref):
    # Grid: (j = H tile [parallel], k = D tile [arbitrary, reduction last]).
    # x_ref: [2, tk] f32   w_ref: [tk, tn] bf16
    # bw_ref/v_ref: [1, tn] f32   o_ref: [1, tn] f32   acc_ref: [2, tn] f32
    k = pl.program_id(1)

    @pl.when(k == 0)
    def _():
        acc_ref[...] = jnp.zeros_like(acc_ref)

    x = x_ref[...].astype(jnp.bfloat16)
    acc_ref[...] += jnp.dot(x, w_ref[...], preferred_element_type=jnp.float32)

    @pl.when(k == pl.num_programs(1) - 1)
    def _():
        h = jnp.maximum(acc_ref[...] + bw_ref[...], 0.0)         # [2, tn]
        d = jnp.abs(h[0:1, :] - h[1:2, :])                       # [1, tn]
        o_ref[...] = d * v_ref[...]        # lane-dense weighted partials (unmasked vst)


def _similarity_tiled(x2, params, tk, tn):
    D = x2.shape[1]
    H = params["bw"].shape[1]
    n_h, n_k = H // tn, D // tk
    partial = pl.pallas_call(
        _siamese_tiled_kernel,
        out_shape=jax.ShapeDtypeStruct((1, H), jnp.float32),
        grid_spec=pltpu.PrefetchScalarGridSpec(
            num_scalar_prefetch=0,
            grid=(n_h, n_k),
            in_specs=[
                pl.BlockSpec((2, tk), lambda j, k: (0, k)),      # x rows (tiny)
                pl.BlockSpec((tk, tn), lambda j, k: (k, j)),     # W tile (the real cost)
                pl.BlockSpec((1, tn), lambda j, k: (0, j)),      # bW tile
                pl.BlockSpec((1, tn), lambda j, k: (0, j)),      # v tile
            ],
            out_specs=pl.BlockSpec((1, tn), lambda j, k: (0, j)),
            scratch_shapes=[pltpu.VMEM((2, tn), jnp.float32)],   # f32 accumulator
        ),
        compiler_params=pltpu.CompilerParams(
            # H tiles are independent -> megacore shards W streaming on v7x;
            # D is the reduction axis (accumulator), must stay "arbitrary".
            dimension_semantics=("parallel", "arbitrary"),
        ),
    )(x2, params["w_bf16"], params["bw"], params["v_row"])
    # Final scalar reduction + bias + sigmoid in the wrapper (keeps H parallel).
    logits = jnp.sum(partial, axis=-1, keepdims=True) + params["bv"][0]
    return jax.nn.sigmoid(logits)                                # [1, 1]


# ----------------------------------------------------------------------------
# Dispatch + module forward
# ----------------------------------------------------------------------------
def siamese_similarity_row0(a_row, b_row, params, *, tk=512, tn=512,
                            force_tiled=False, resident_max_bytes=4 << 20):
    """sigmoid(|relu(aW+bW) - relu(bW_b+bW)| @ v + bv) for one row pair.

    a_row, b_row: [1, D] f32.  Returns [1, 1] f32.
    """
    x2 = jnp.concatenate([a_row, b_row], axis=0)  # [2, D]; no zero-row padding
    D = x2.shape[1]
    H = params["bw"].shape[1]
    w_bytes = D * H * 2  # bf16
    if force_tiled or w_bytes > resident_max_bytes:
        tk_, tn_ = min(tk, D), min(tn, H)
        if D % tk_ == 0 and H % tn_ == 0 and tk_ % 128 == 0 and tn_ % 128 == 0:
            return _similarity_tiled(x2, params, tk_, tn_)
        # TODO(synk): ragged D/H (non-multiple-of-128 tails) would need padded
        # tiles or pl.BoundedSlice; fall back to the resident path for now.
    return _similarity_resident(x2, params)


def one_shot_learning_forward(cur_val, comp_vals, params, **kw):
    """Mirror of OneShotLearning.forward: returns sim[0].reshape(-1) -> [1]."""
    a_row = cur_val[0][0:1]        # forward() only consumes sim[0] -> row 0 only
    b_row = comp_vals[0][0:1]
    sim0 = siamese_similarity_row0(a_row, b_row, params, **kw)   # [1, 1]
    return sim0[0].reshape(-1)                                   # [1]


def init_params(key, d_in, d_hidden):
    """Weights converted to kernel-ready layouts ONCE (no per-call casts)."""
    k1, k2 = jax.random.split(key)
    w = jax.random.normal(k1, (d_in, d_hidden), jnp.float32) * (1.0 / jnp.sqrt(d_in))
    v = jax.random.normal(k2, (d_hidden, 1), jnp.float32) * (1.0 / jnp.sqrt(d_hidden))
    bw = jnp.zeros((1, d_hidden), jnp.float32)
    bv = jnp.zeros((1, 1), jnp.float32)
    return dict(
        w_bf16=w.astype(jnp.bfloat16),                    # persistent bf16 MXU operand
        bw=bw,                                            # [1, H] f32
        v_row=v.reshape(1, d_hidden).astype(jnp.float32), # lane-dense head weights
        bv=bv.reshape(1).astype(jnp.float32),             # scalar -> SMEM
        w_f32=w, v_f32=v, bv_f32=bv,                      # f32 copies for the reference
    )


def _reference_forward(cur_val, comp_vals, params):
    """Pure-JAX f32 reference of the same siamese forward (row 0 only)."""
    w, bw, v, bv = params["w_f32"], params["bw"], params["v_f32"], params["bv_f32"]
    a, b = cur_val[0], comp_vals[0]
    ha = jnp.maximum(a @ w + bw, 0.0)
    hb = jnp.maximum(b @ w + bw, 0.0)
    sim = jax.nn.sigmoid(jnp.abs(ha - hb) @ v + bv)       # [B, 1]
    return sim[0].reshape(-1)


if __name__ == "__main__":
    key = jax.random.PRNGKey(0)

    # ---- small (8,128)-aligned shape: resident-W path --------------------
    B, D, H = 8, 128, 128
    k_a, k_b, k_p, k_rest = jax.random.split(key, 4)
    cur_val = (jax.random.normal(k_a, (B, D), jnp.float32),)
    comp_vals = (jax.random.normal(k_b, (B, D), jnp.float32),)
    params = init_params(k_p, D, H)

    out = one_shot_learning_forward(cur_val, comp_vals, params)
    jax.block_until_ready(out)
    assert out.shape == (1,), f"unexpected output shape {out.shape}"
    assert bool(jnp.isfinite(out).all()), "non-finite output"
    ref = _reference_forward(cur_val, comp_vals, params)
    assert bool(jnp.allclose(out, ref, atol=5e-2, rtol=5e-2)), (
        f"resident mismatch: kernel={out} ref={ref}")

    # ---- larger shape forcing the tiled path (grid 2x2, tk=tn=256) -------
    D2, H2 = 512, 512
    k_a2, k_b2, k_p2 = jax.random.split(k_rest, 3)
    cur_val2 = (jax.random.normal(k_a2, (B, D2), jnp.float32),)
    comp_vals2 = (jax.random.normal(k_b2, (B, D2), jnp.float32),)
    params2 = init_params(k_p2, D2, H2)

    out2 = one_shot_learning_forward(cur_val2, comp_vals2, params2,
                                     tk=256, tn=256, force_tiled=True)
    jax.block_until_ready(out2)
    assert out2.shape == (1,), f"unexpected output shape {out2.shape}"
    assert bool(jnp.isfinite(out2).all()), "non-finite output"
    ref2 = _reference_forward(cur_val2, comp_vals2, params2)
    assert bool(jnp.allclose(out2, ref2, atol=5e-2, rtol=5e-2)), (
        f"tiled mismatch: kernel={out2} ref={ref2}")

    print("KERNEL_OK")
</pallas_src>

<mosaic_0001>
module attributes {stable_mosaic.version = 11 : i64} {
  func.func @_siamese_resident_kernel(%arg0: memref<2x128xf32, #tpu.memory_space<vmem>>, %arg1: memref<128x128xbf16, #tpu.memory_space<vmem>>, %arg2: memref<1x128xf32, #tpu.memory_space<vmem>>, %arg3: memref<1x128xf32, #tpu.memory_space<vmem>>, %arg4: memref<1xf32, #tpu.memory_space<smem>>, %arg5: memref<1x1xf32, #tpu.memory_space<vmem>>) attributes {dimension_semantics = [], scalar_prefetch = 0 : i64, scratch_operands = 0 : i64, tpu.core_type = #tpu.core_type<tc>} {
    %c0 = arith.constant 0 : index
    %c0_0 = arith.constant 0 : index
    %0 = vector.load %arg0[%c0, %c0_0] : memref<2x128xf32, #tpu.memory_space<vmem>>, vector<2x128xf32>
    %1 = arith.truncf %0 : vector<2x128xf32> to vector<2x128xbf16>
    %c0_1 = arith.constant 0 : index
    %c0_2 = arith.constant 0 : index
    %2 = vector.load %arg1[%c0_1, %c0_2] : memref<128x128xbf16, #tpu.memory_space<vmem>>, vector<128x128xbf16>
    %cst = arith.constant dense<0.000000e+00> : vector<2x128xf32>
    %3 = tpu.matmul %1, %2, %cst {dimension_numbers = #tpu.dot_dimension_numbers<[1], [0], [0], [1], [0, 0, 1, 1], [], []>} : vector<2x128xbf16>, vector<128x128xbf16>, vector<2x128xf32> -> vector<2x128xf32>
    %c0_3 = arith.constant 0 : index
    %c0_4 = arith.constant 0 : index
    %4 = vector.load %arg2[%c0_3, %c0_4] : memref<1x128xf32, #tpu.memory_space<vmem>>, vector<1x128xf32>
    %5 = vector.broadcast %4 : vector<1x128xf32> to vector<2x128xf32>
    %6 = arith.addf %3, %5 : vector<2x128xf32>
    %cst_5 = arith.constant 0.000000e+00 : f32
    %7 = vector.broadcast %cst_5 : f32 to vector<2x128xf32>
    %8 = arith.maximumf %6, %7 : vector<2x128xf32>
    %9 = vector.extract_strided_slice %8 {offsets = [0, 0], sizes = [1, 128], strides = [1, 1]} : vector<2x128xf32> to vector<1x128xf32>
    %10 = vector.extract_strided_slice %8 {offsets = [1, 0], sizes = [1, 128], strides = [1, 1]} : vector<2x128xf32> to vector<1x128xf32>
    %11 = arith.subf %9, %10 : vector<1x128xf32>
    %12 = math.absf %11 : vector<1x128xf32>
    %c0_6 = arith.constant 0 : index
    %c0_7 = arith.constant 0 : index
    %13 = vector.load %arg3[%c0_6, %c0_7] : memref<1x128xf32, #tpu.memory_space<vmem>>, vector<1x128xf32>
    %14 = arith.mulf %12, %13 : vector<1x128xf32>
    %cst_8 = arith.constant dense<0.000000e+00> : vector<1xf32>
    %15 = vector.multi_reduction <add>, %14, %cst_8 [1] : vector<1x128xf32> to vector<1xf32>
    %16 = vector.shape_cast %15 : vector<1xf32> to vector<1x1xf32>
    %c0_9 = arith.constant 0 : index
    %17 = memref.load %arg4[%c0_9] : memref<1xf32, #tpu.memory_space<smem>>
    %18 = vector.broadcast %17 : f32 to vector<1x1xf32>
    %19 = arith.addf %16, %18 : vector<1x1xf32>
    %20 = arith.negf %19 : vector<1x1xf32>
    %21 = math.exp %20 : vector<1x1xf32>
    %cst_10 = arith.constant 1.000000e+00 : f32
    %22 = vector.broadcast %cst_10 : f32 to vector<1x1xf32>
    %23 = arith.addf %22, %21 : vector<1x1xf32>
    %24 = arith.divf %22, %23 : vector<1x1xf32>
    %c0_11 = arith.constant 0 : index
    %c0_12 = arith.constant 0 : index
    %25 = vector.load %arg5[%c0_11, %c0_12] : memref<1x1xf32, #tpu.memory_space<vmem>>, vector<1x1xf32>
    tpu.vector_store %arg5[%c0_11, %c0_12], %24 {strides = array<i32>} : memref<1x1xf32, #tpu.memory_space<vmem>>, vector<1x1xf32>,
    return
  }
}

</mosaic_0001>

<bundles_post_ra>
// kernel: tpu_custom_call.1
= control target key start
LH: loop header
LB: loop body
LE: loop exit
PB: predicated region body
PF: predicated region fallthrough
CT: control target
= control target key end

     0   :  { %11 = vsyncpa [#allocation4], 0  ;;  %s343_s0 = inlined_call_operand.vmem [shape: f32[2,128], index: 0, kind: input, shape index: {}]   ;;  %s344_s1 = inlined_call_operand.hbm [shape: bf16[128,128], index: 1, kind: input, shape index: {}]   ;;  %s345_s2 = inlined_call_operand.vmem [shape: f32[1,128], index: 2, kind: input, shape index: {}]   ;;  %s346_s3 = inlined_call_operand.vmem [shape: f32[1,128], index: 3, kind: input, shape index: {}]   ;;  %s347_s4 = inlined_call_operand.<no memory space> [shape: f32[1], index: 4, kind: input, shape index: {}]   ;;  %s348_s5 = inlined_call_operand.hbm [shape: f32[1,1], index: 5, kind: output, shape index: {}]  }
   0x1   :  { %12 = vsyncpa [#allocation5], 0  ;;  %s289_s18 = smov [#allocation3]  }
   0x2   :  { %s20_s19 = sshll.u32 %s289_s18, 4  ;;  %s21_s19 = int_to_ptr.vmem [resolvable:$true] %s20_s19 }
   0x3   :  { %s253_s20 = scalar_lea.vmem %s21_s19, 1024  ;;  %p258_p1 = scmp.lt.s32.totalorder %s21_s19, %s21_s19 }
   0x4   :  { %p254_p0 = scmp.ne.s32.totalorder %s21_s19, %s253_s20  ;;  %p259_p2 = scmp.lt.s32.totalorder %s253_s20, %s253_s20 }
   0x6   :  { %p260_p3 = por %p259_p2, %p258_p1 }
   0x8   :  { %p261_p4 = pnand %p260_p3, %p254_p0 }
   0xa   :  { %264 = shalt.err (!%p261_p4)
}
   0xb   :  { %s290_s21 = smov 64   ;;  %s291_s22 = smov 4  }
   0xc   :  { %26 = dma.hbm_to_vmem [thread:$0]  %s344_s1, 1024, %s21_s19, [#allocation4], %s290_s21, %s290_s21, %s291_s22  }
   0xd   :  { %285 = dma.done.wait [#allocation4], 1024  }
   0xe   :  { %286 = vsyncadd [#allocation4], 4294966272  ;;  %v292_v0 = vmov 0.0   ;;  %vm293_vm0 = vmmov 0   ;;  %v233_v1 = vld [vmem:[#allocation3 + $0x38] sm:$0xff]   ;;  %v234_v2 = vld [vmem:[#allocation3 + $0x30] sm:$0xff]   ;;  %v163_v24 = vstv %s347_s4 }
   0xf   :  { %207 = vmatprep.subr.bf16.mxu0 %v292_v0  ;;  %223 = vmatprep.mubr.msk.bf16.mxu0 %vm293_vm0, %v292_v0  ;;  %v235_v3 = vld [vmem:[#allocation3 + $0x28] sm:$0xff]   ;;  %v236_v4 = vld [vmem:[#allocation3 + $0x20] sm:$0xff]   ;;  %v237_v5 = vld [vmem:[#allocation3 + $0x18] sm:$0xff]   ;;  %vm158_vm1 = vcmask 1040384   ;;  %vm171_vm2 = vcmask 0  }
  0x10   :  { %208 = vmatpush3.bf16.msra.mxu0 %v233_v1  ;;  %v238_v6 = vld [vmem:[#allocation3 + $0x10] sm:$0xff]   ;;  %v239_v7 = vld [vmem:[#allocation3 + $0x8] sm:$0xff]   ;;  %v240_v8 = vld [vmem:[#allocation3] sm:$0xff]  }
  0x11   :  { %209 = vmatprep.subr.bf16.mxu0 %v292_v0  ;;  %v37_v9 = vld [vmem:[%s343_s0] sm:$0x3] }
  0x12   :  { %v38_v10 = vpack.c.bf16 %v37_v9, %v37_v9  ;;  %v188_v11 = vld [vmem:[%s345_s2] ss:$0 sm:$0xff]  ;;  %s294_s2 = smov [#allocation6]  }
  0x13   :  { %v156_v20 = vld [vmem:[%s346_s3] sm:$0x1]  ;;  %s179_s6 = sshll.u32 %s294_s2, 4  ;;  %s180_s6 = int_to_ptr.vmem [resolvable:$true] %s179_s6 }
  0x14   :  { %210 = vmatpush3.bf16.msra.mxu0 %v234_v2  ;;  %s265_s3 = scalar_lea.vmem %s180_s6, 16  ;;  %s269_s7 = scalar_lea.vmem %s180_s6, 32 }
  0x15   :  { %211 = vmatprep.subr.bf16.mxu0 %v292_v0  ;;  %p266_p5 = scmp.ne.s32.totalorder %s180_s6, %s265_s3  ;;  %p270_p6 = scmp.lt.s32.totalorder %s180_s6, %s180_s6 }
  0x16   :  { %p271_p7 = scmp.lt.s32.totalorder %s269_s7, %s265_s3 }
  0x18   :  { %212 = vmatpush3.bf16.msra.mxu0 %v235_v3  ;;  %p272_p8 = por %p271_p7, %p270_p6 }
  0x19   :  { %213 = vmatprep.subr.bf16.mxu0 %v292_v0 }
  0x1a   :  { %p273_p9 = pnand %p272_p8, %p266_p5 }
  0x1c   :  { %214 = vmatpush3.bf16.msra.mxu0 %v236_v4 }
  0x1d   :  { %215 = vmatprep.subr.bf16.mxu0 %v292_v0 }
  0x20   :  { %216 = vmatpush3.bf16.msra.mxu0 %v237_v5 }
  0x21   :  { %217 = vmatprep.subr.bf16.mxu0 %v292_v0 }
  0x24   :  { %218 = vmatpush3.bf16.msra.mxu0 %v238_v6 }
  0x25   :  { %219 = vmatprep.subr.bf16.mxu0 %v292_v0 }
  0x28   :  { %220 = vmatpush3.bf16.msra.mxu0 %v239_v7 }
  0x29   :  { %221 = vmatprep.subr.bf16.mxu0 %v292_v0 }
  0x2c   :  { %222 = vmatpush3.bf16.msra.mxu0 %v240_v8 }
  0x2f   :  { %224 = vmatmul.mubr.bf16.vlgmr.msra.gmra.mxu0 %v38_v10 }
  0xef   :  { %v144_v12 = vpop.f32.mrf.mxu0 }
  0xf0   :  { %v145_v13 = vadd.f32 %v188_v11, %v144_v12 }
  0xf1   :  { %v225_v14 = vpop.f32.mrf.mxu0 }
  0xf2   :  { %v150_v15 = vmax.f32 %v145_v13, 0.0 }
  0xf3   :  { %v147_v16 = vpop.f32.mrf.mxu0 }
  0xf4   :  { %v152_v17 = vrot.slane %v150_v15, 1 }
  0xf5   :  { %v226_v18 = vpop.f32.mrf.mxu0 }
  0xf6   :  { %v154_v19 = vsub.f32 %v150_v15, %v152_v17 }
  0xf8   :  { %v155_v21 = vand.u32 2147483647, %v154_v19 }
  0xfa   :  { %v157_v22 = vmul.f32 %v156_v20, %v155_v21 }
  0xfc   :  { %v159_v23 = vsel %vm158_vm1, %v157_v22, 0.0 }
  0xfd   :  { %160 = vadd.xlane.f32.xlu0 %v159_v23 }
 0x186   :  { %v161_v25 = vpop.xlane.xlu0 %160 }
 0x187   :  { %v164_v26 = vadd.f32 %v163_v24, %v161_v25 }
 0x189   :  { %v197_v27 = vmul.f32 -1.442695, %v164_v26 }
 0x18b   :  { %241 = vpow2.f32 %v197_v27 }
 0x198   :  { %v242_v28 = vpop.eup %241 }
 0x199   :  { %v168_v29 = vadd.f32 1.0, %v242_v28 }
 0x19b   :  { %243 = vrcp.f32 %v168_v29 }
 0x1a8   :  { %v244_v30 = vpop.eup %243 }
 0x1a9   :  { %172 = vst.msk [vmem:[#allocation6] sm:$0x1] %vm171_vm2, %v244_v30 }
 0x1aa   :  { %276 = shalt.err (!%p273_p9)
}
 0x1ab   :  { %182 = dma.vmem_to_hbm [thread:$0]  %s180_s6, 16, %s348_s5, [#allocation5]  }
 0x1ac   :  { %287 = dma.done.wait [#allocation5], 16  }
 0x1ad   :  { %288 = vsyncadd [#allocation5], 4294967280 }
 0x1ae   :  { %186 = vsyncpa [#allocation4], 1 }
 0x1af   :  { %187 = vsyncpa [#allocation5], 1 }

</bundles_post_ra>
